<compile_context>
chip_gen: v7x
topology: tpu7x:2x2x1
jax: 0.10.0
libtpu: 0.0.40
codegen_flags: <defaults>
</compile_context>

<pallas_src>
import functools

import jax
import jax.numpy as jnp
from jax import lax
from jax.experimental import pallas as pl
from jax.experimental.pallas import tpu as pltpu


def _round_up(x, m):
    return ((x + m - 1) // m) * m


# ---------------------------------------------------------------------------
# Tiled matmul + bias kernel:  out = A @ W + b   (W pre-transposed, no .T)
# Used both for the hoisted LSTM input projection and for the output dense.
# ---------------------------------------------------------------------------
def _matmul_bias_kernel(a_ref, w_ref, b_ref, o_ref):
    o_ref[...] = (jnp.dot(a_ref[...], w_ref[...],
                          preferred_element_type=jnp.float32)
                  + b_ref[...]).astype(o_ref.dtype)


def matmul_bias_pallas(a, w_t, b_row, *, tm_max=256, tv_max=512,
                       out_dtype=jnp.float32):
    """a: (N, K), w_t: (K, V), b_row: (1, V) -> (N, V) in out_dtype."""
    N, K = a.shape
    K2, V = w_t.shape
    assert K == K2, (K, K2)

    tm = min(tm_max, _round_up(N, 8))        # rows per block (sublane mult. 8)
    tv = min(tv_max, _round_up(V, 128))      # vocab per block (lane mult. 128)
    Np = _round_up(N, tm)
    Vp = _round_up(V, tv)

    a_p = a if Np == N else jnp.pad(a, ((0, Np - N), (0, 0)))
    w_p = w_t if Vp == V else jnp.pad(w_t, ((0, 0), (0, Vp - V)))
    b_p = b_row if Vp == V else jnp.pad(b_row, ((0, 0), (0, Vp - V)))

    # TODO(synk): for very large K, add a third ("arbitrary") grid axis over K
    # with a VMEM accumulator; K fits comfortably at these hidden sizes.
    out = pl.pallas_call(
        _matmul_bias_kernel,
        out_shape=jax.ShapeDtypeStruct((Np, Vp), out_dtype),
        grid_spec=pltpu.PrefetchScalarGridSpec(
            num_scalar_prefetch=0,
            grid=(Np // tm, Vp // tv),
            in_specs=[
                pl.BlockSpec((tm, K), lambda i, j: (i, 0)),   # A rows
                pl.BlockSpec((K, tv), lambda i, j: (0, j)),   # W^T columns
                pl.BlockSpec((1, tv), lambda i, j: (0, j)),   # bias slice
            ],
            out_specs=pl.BlockSpec((tm, tv), lambda i, j: (i, j)),
        ),
        compiler_params=pltpu.CompilerParams(
            dimension_semantics=("parallel", "parallel")),
    )(a_p, w_p, b_p)
    return out[:N, :V]


# ---------------------------------------------------------------------------
# LSTM recurrence kernel: one grid step == a CHUNK of timesteps.
# gates_x (precomputed x@W_ih^T + b) is streamed per chunk; only h@W_hh^T is
# computed per step.  PyTorch nn.LSTM gate order (i, f, g, o).
# ---------------------------------------------------------------------------
def _lstm_kernel(gx_ref, whh_t_ref, h0_ref, c0_ref,
                 out_ref, hN_ref, cN_ref,
                 h_sc, c_sc, *, hidden, t_block, seq_len):
    tb = pl.program_id(0)

    @pl.when(tb == 0)
    def _init():
        h_sc[...] = h0_ref[...]
        c_sc[...] = c0_ref[...]

    H = hidden
    whh_t = whh_t_ref[...]                    # (H, 4H), resident across steps

    def step(i, carry):
        t_global = tb * t_block + i
        h_prev = h_sc[...]
        c_prev = c_sc[...]
        gates = gx_ref[i] + jnp.dot(
            h_prev.astype(whh_t.dtype), whh_t,
            preferred_element_type=jnp.float32)            # (B, 4H) f32
        i_g = jax.nn.sigmoid(gates[:, 0 * H:1 * H])
        f_g = jax.nn.sigmoid(gates[:, 1 * H:2 * H])
        g_g = jnp.tanh(gates[:, 2 * H:3 * H])
        o_g = jax.nn.sigmoid(gates[:, 3 * H:4 * H])
        c_new = f_g * c_prev + i_g * g_g
        h_new = o_g * jnp.tanh(c_new)
        # Mask padded tail timesteps so the final state stays at t = T-1.
        valid = t_global < seq_len
        c_upd = jnp.where(valid, c_new, c_prev)
        h_upd = jnp.where(valid, h_new, h_prev)
        c_sc[...] = c_upd
        h_sc[...] = h_upd
        out_ref[i] = h_upd.astype(out_ref.dtype)
        return carry

    lax.fori_loop(0, t_block, step, 0, unroll=True)

    @pl.when(tb == pl.num_programs(0) - 1)
    def _fin():
        hN_ref[...] = h_sc[...].astype(hN_ref.dtype)
        cN_ref[...] = c_sc[...].astype(cN_ref.dtype)


def lstm_pallas(gates_x, w_hh_t, h0, c0, *, t_block=16):
    """gates_x: (T, B, 4H) time-major (already includes x@W_ih^T + bias),
    w_hh_t: (H, 4H), h0/c0: (B, H).  Returns (out (T,B,H), hN, cN)."""
    T, B, G = gates_x.shape
    H = h0.shape[-1]
    assert G == 4 * H

    tb = min(t_block, T)
    Tp = _round_up(T, tb)
    if Tp != T:
        gates_x = jnp.pad(gates_x, ((0, Tp - T), (0, 0), (0, 0)))

    kernel = functools.partial(_lstm_kernel, hidden=H, t_block=tb, seq_len=T)
    out_shapes = (
        jax.ShapeDtypeStruct((Tp, B, H), jnp.float32),   # all hidden states
        jax.ShapeDtypeStruct((B, H), jnp.float32),       # h_T
        jax.ShapeDtypeStruct((B, H), jnp.float32),       # c_T
    )
    # TODO(synk): for v5e lane-density, H could be padded to a 128 multiple so
    # the per-chunk h stores are unmasked; left as-is at these sizes.
    out, hN, cN = pl.pallas_call(
        kernel,
        out_shape=out_shapes,
        grid_spec=pltpu.PrefetchScalarGridSpec(
            num_scalar_prefetch=0,
            grid=(Tp // tb,),
            in_specs=[
                pl.BlockSpec((tb, B, G), lambda t: (t, 0, 0)),   # gates_x chunk
                pl.BlockSpec((H, G), lambda t: (0, 0)),          # W_hh^T
                pl.BlockSpec((B, H), lambda t: (0, 0)),          # h0
                pl.BlockSpec((B, H), lambda t: (0, 0)),          # c0
            ],
            out_specs=[
                pl.BlockSpec((tb, B, H), lambda t: (t, 0, 0)),
                pl.BlockSpec((B, H), lambda t: (0, 0)),
                pl.BlockSpec((B, H), lambda t: (0, 0)),
            ],
            scratch_shapes=[
                pltpu.VMEM((B, H), jnp.float32),   # h carry
                pltpu.VMEM((B, H), jnp.float32),   # c carry
            ],
        ),
        compiler_params=pltpu.CompilerParams(
            dimension_semantics=("arbitrary",)),   # time recurrence: sequential
    )(gates_x, w_hh_t, h0, c0)
    return out[:T], hN, cN


# ---------------------------------------------------------------------------
# Module wrapper (mirrors RNNModule.forward)
# ---------------------------------------------------------------------------
def init_params(key, n_vocab, embedding_size, lstm_size):
    ks = jax.random.split(key, 7)
    s = 0.1
    return {
        "embedding": jax.random.normal(ks[0], (n_vocab, embedding_size),
                                       jnp.float32) * s,
        "w_ih": jax.random.normal(ks[1], (4 * lstm_size, embedding_size),
                                  jnp.float32) * s,
        "w_hh": jax.random.normal(ks[2], (4 * lstm_size, lstm_size),
                                  jnp.float32) * s,
        "b_ih": jax.random.normal(ks[3], (4 * lstm_size,), jnp.float32) * s,
        "b_hh": jax.random.normal(ks[4], (4 * lstm_size,), jnp.float32) * s,
        "w_dense": jax.random.normal(ks[5], (n_vocab, lstm_size),
                                     jnp.float32) * s,
        "b_dense": jax.random.normal(ks[6], (n_vocab,), jnp.float32) * s,
    }


def rnn_module_forward(params, x_tokens, prev_state, *,
                       compute_dtype=jnp.float32, t_block=16):
    """x_tokens: int32 (B, T); prev_state: (h0, c0) each (1, B, H).
    Returns (logits (B, T, V), (h_T, c_T) each (1, B, H)).
    compute_dtype controls the MXU operand dtype (f32 or bf16); gate math,
    carries and accumulation stay in f32."""
    B, T = x_tokens.shape
    H = params["w_hh"].shape[1]
    E = params["embedding"].shape[1]
    V = params["w_dense"].shape[0]

    # Embedding lookup — data-dependent gather kept as JAX glue.
    embed = params["embedding"][x_tokens]                  # (B, T, E)

    # Pre-transposed weights (wrapper-side layout plumbing, no in-kernel .T).
    w_ih_t = jnp.transpose(params["w_ih"]).astype(compute_dtype)      # (E, 4H)
    w_hh_t = jnp.transpose(params["w_hh"]).astype(compute_dtype)      # (H, 4H)
    w_dense_t = jnp.transpose(params["w_dense"]).astype(compute_dtype)  # (H, V)
    bias = (params["b_ih"] + params["b_hh"]).reshape(1, -1)           # (1, 4H)

    # Pad batch to a sublane multiple of 8 (unmasked vregs in the recurrence).
    Bp = _round_up(B, 8)
    h0 = prev_state[0][0]                                   # (B, H)
    c0 = prev_state[1][0]                                   # (B, H)
    if Bp != B:
        embed = jnp.pad(embed, ((0, Bp - B), (0, 0), (0, 0)))
        h0 = jnp.pad(h0, ((0, Bp - B), (0, 0)))
        c0 = jnp.pad(c0, ((0, Bp - B), (0, 0)))

    # Hoisted input projection: one large MXU matmul over all timesteps,
    # bias fused here (removed from the per-step recurrence).
    x2d = embed.reshape(Bp * T, E).astype(compute_dtype)
    gates_x2d = matmul_bias_pallas(x2d, w_ih_t, bias)       # (Bp*T, 4H), f32
    gates_x = jnp.transpose(gates_x2d.reshape(Bp, T, 4 * H), (1, 0, 2))

    out_tme, hN, cN = lstm_pallas(gates_x, w_hh_t, h0, c0, t_block=t_block)

    out = jnp.transpose(out_tme[:, :B], (1, 0, 2))          # (B, T, H)
    hN = hN[:B]
    cN = cN[:B]

    # Output projection: tiled, vocab lane-dense.
    logits2d = matmul_bias_pallas(
        out.reshape(B * T, H).astype(compute_dtype),
        w_dense_t,
        params["b_dense"].reshape(1, -1))
    logits = logits2d.reshape(B, T, V)
    return logits, (hN[None], cN[None])


# ---------------------------------------------------------------------------
# Pure-JAX reference (mirrors torch semantics) for correctness checking
# ---------------------------------------------------------------------------
def rnn_reference(params, x_tokens, prev_state):
    embed = params["embedding"][x_tokens]                    # (B, T, E)
    h = prev_state[0][0]
    c = prev_state[1][0]
    H = h.shape[-1]
    bias = params["b_ih"] + params["b_hh"]

    def step(carry, x_t):
        h, c = carry
        gates = x_t @ params["w_ih"].T + h @ params["w_hh"].T + bias
        i = jax.nn.sigmoid(gates[:, 0 * H:1 * H])
        f = jax.nn.sigmoid(gates[:, 1 * H:2 * H])
        g = jnp.tanh(gates[:, 2 * H:3 * H])
        o = jax.nn.sigmoid(gates[:, 3 * H:4 * H])
        c = f * c + i * g
        h = o * jnp.tanh(c)
        return (h, c), h

    (hN, cN), outs = lax.scan(step, (h, c), jnp.transpose(embed, (1, 0, 2)))
    out = jnp.transpose(outs, (1, 0, 2))                     # (B, T, H)
    logits = out @ params["w_dense"].T + params["b_dense"]
    return logits, (hN[None], cN[None])


if __name__ == "__main__":
    # Small shapes consistent with the module.
    n_vocab, seq_size, embedding_size, lstm_size = 64, 8, 32, 32
    batch = 2

    key = jax.random.PRNGKey(0)
    k_param, k_tok = jax.random.split(key)
    params = init_params(k_param, n_vocab, embedding_size, lstm_size)

    x_tokens = jax.random.randint(k_tok, (batch, seq_size), 0, n_vocab,
                                  dtype=jnp.int32)
    zero_state = (jnp.zeros((1, batch, lstm_size), jnp.float32),
                  jnp.zeros((1, batch, lstm_size), jnp.float32))

    # f32 path: exact PyTorch-equivalent semantics.
    logits, (hN, cN) = rnn_module_forward(params, x_tokens, zero_state,
                                          compute_dtype=jnp.float32)
    jax.block_until_ready((logits, hN, cN))

    ref_logits, (ref_h, ref_c) = rnn_reference(params, x_tokens, zero_state)
    assert logits.shape == (batch, seq_size, n_vocab)
    assert hN.shape == (1, batch, lstm_size) and cN.shape == (1, batch, lstm_size)
    assert jnp.allclose(logits, ref_logits, atol=1e-5, rtol=1e-5)
    assert jnp.allclose(hN, ref_h, atol=1e-5, rtol=1e-5)
    assert jnp.allclose(cN, ref_c, atol=1e-5, rtol=1e-5)

    # bf16 matmul-operand path (2x MXU throughput, half the weight DMA bytes);
    # f32 accumulation / gate math, so only a loose tolerance is expected.
    logits_bf, (h_bf, c_bf) = rnn_module_forward(params, x_tokens, zero_state,
                                                 compute_dtype=jnp.bfloat16)
    jax.block_until_ready((logits_bf, h_bf, c_bf))
    assert jnp.allclose(logits_bf, ref_logits, atol=5e-2, rtol=5e-2)
    assert jnp.allclose(h_bf, ref_h, atol=5e-2, rtol=5e-2)
    assert jnp.allclose(c_bf, ref_c, atol=5e-2, rtol=5e-2)

    print("KERNEL_OK")
</pallas_src>

<mosaic_0001>
module attributes {stable_mosaic.version = 11 : i64} {
  func.func @_matmul_bias_kernel(%arg0: i32, %arg1: i32, %arg2: memref<64x32xf32, #tpu.memory_space<vmem>>, %arg3: memref<32x128xf32, #tpu.memory_space<vmem>>, %arg4: memref<1x128xf32, #tpu.memory_space<vmem>>, %arg5: memref<64x128xf32, #tpu.memory_space<vmem>>) attributes {dimension_semantics = [#tpu.dimension_semantics<parallel>, #tpu.dimension_semantics<parallel>], iteration_bounds = array<i64: 1, 1>, scalar_prefetch = 0 : i64, scratch_operands = 0 : i64, tpu.core_type = #tpu.core_type<tc>, window_params = [{transform_indices = @transform_0, window_bounds = array<i64: 64, 32>}, {transform_indices = @transform_1, window_bounds = array<i64: 32, 128>}, {transform_indices = @transform_2, window_bounds = array<i64: 1, 128>}, {transform_indices = @transform_3, window_bounds = array<i64: 64, 128>}]} {
    %c0 = arith.constant 0 : index
    %c0_0 = arith.constant 0 : index
    %0 = vector.load %arg2[%c0, %c0_0] : memref<64x32xf32, #tpu.memory_space<vmem>>, vector<64x32xf32>
    %c0_1 = arith.constant 0 : index
    %c0_2 = arith.constant 0 : index
    %1 = vector.load %arg3[%c0_1, %c0_2] : memref<32x128xf32, #tpu.memory_space<vmem>>, vector<32x128xf32>
    %cst = arith.constant dense<0.000000e+00> : vector<64x128xf32>
    %2 = tpu.matmul %0, %1, %cst {dimension_numbers = #tpu.dot_dimension_numbers<[1], [0], [0], [1], [0, 0, 1, 1], [], []>} : vector<64x32xf32>, vector<32x128xf32>, vector<64x128xf32> -> vector<64x128xf32>
    %c0_3 = arith.constant 0 : index
    %c0_4 = arith.constant 0 : index
    %3 = vector.load %arg4[%c0_3, %c0_4] : memref<1x128xf32, #tpu.memory_space<vmem>>, vector<1x128xf32>
    %4 = vector.broadcast %3 : vector<1x128xf32> to vector<64x128xf32>
    %5 = arith.addf %2, %4 : vector<64x128xf32>
    %c0_5 = arith.constant 0 : index
    %c0_6 = arith.constant 0 : index
    %6 = vector.load %arg5[%c0_5, %c0_6] : memref<64x128xf32, #tpu.memory_space<vmem>>, vector<64x128xf32>
    tpu.vector_store %arg5[%c0_5, %c0_6], %5 {strides = array<i32>} : memref<64x128xf32, #tpu.memory_space<vmem>>, vector<64x128xf32>,
    return
  }
  func.func @transform_0(%arg0: i32, %arg1: i32) -> (i32, i32) {
    %c0_i32 = arith.constant 0 : i32
    %c0_i32_0 = arith.constant 0 : i32
    return %arg0, %c0_i32 : i32, i32
  }
  func.func @transform_1(%arg0: i32, %arg1: i32) -> (i32, i32) {
    %c0_i32 = arith.constant 0 : i32
    %c0_i32_0 = arith.constant 0 : i32
    return %c0_i32, %arg1 : i32, i32
  }
  func.func @transform_2(%arg0: i32, %arg1: i32) -> (i32, i32) {
    %c0_i32 = arith.constant 0 : i32
    %c0_i32_0 = arith.constant 0 : i32
    return %c0_i32, %arg1 : i32, i32
  }
  func.func @transform_3(%arg0: i32, %arg1: i32) -> (i32, i32) {
    %c0_i32 = arith.constant 0 : i32
    return %arg0, %arg1 : i32, i32
  }
}

</mosaic_0001>

<bundles_post_ra>
// kernel: tpu_custom_call.1
= control target key start
LH: loop header
LB: loop body
LE: loop exit
PB: predicated region body
PF: predicated region fallthrough
CT: control target
= control target key end

     0   :  { %vm34_vm0 = vcmask 261120   ;;  %s350_s0 = inlined_call_operand.vmem [shape: f32[64,32], index: 0, kind: input, shape index: {}]   ;;  %s351_s1 = inlined_call_operand.vmem [shape: f32[32,128], index: 1, kind: input, shape index: {}]   ;;  %s352_s2 = inlined_call_operand.vmem [shape: f32[1,128], index: 2, kind: input, shape index: {}]   ;;  %s353_s3 = inlined_call_operand.hbm [shape: f32[64,128], index: 3, kind: output, shape index: {}]  }
   0x1   :  { %v23_v0 = vld [vmem:[%s351_s1] sm:$0xff]  ;;  %v24_v1 = vld [vmem:[%s351_s1 + $0x8] sm:$0xff]  ;;  %v25_v2 = vld [vmem:[%s351_s1 + $0x10] sm:$0xff] }
   0x2   :  { %v229_v3 = vpack.c.bf16 %v24_v1, %v23_v0  ;;  %v26_v4 = vld [vmem:[%s351_s1 + $0x18] sm:$0xff]  ;;  %v15_v5 = vld [vmem:[%s350_s0] sm:$0xff] }
   0x3   :  { %v19_v6 = vld [vmem:[%s350_s0 + $0x20] sm:$0xff]  ;;  %v233_v7 = vpack.c.bf16 %v26_v4, %v25_v2  ;;  %217 = vmatprep.mubr.msk.f32.mxu0 %vm34_vm0, %v15_v5 }
   0x4   :  { %223 = vmatprep.mubr.msk.f32.mxu1 %vm34_vm0, %v19_v6  ;;  %230 = vmatprep.subr.bf16.mxu0 %v229_v3 }
   0x5   :  { %237 = vmatprep.subr.bf16.mxu1 %v229_v3  ;;  %232 = vmatpush3.bf16.msra.mxu0 %v229_v3 }
   0x6   :  { %239 = vmatpush3.bf16.msra.mxu1 %v229_v3 }
   0x7   :  { %8 = vsyncpa [#allocation3], 0  ;;  %234 = vmatprep.subr.bf16.mxu0 %v233_v7  ;;  %238 = vmatprep.subr.bf16.mxu1 %v233_v7  ;;  %v16_v8 = vld [vmem:[%s350_s0 + $0x8] sm:$0xff]  ;;  %v17_v10 = vld [vmem:[%s350_s0 + $0x10] sm:$0xff]  ;;  %s268_s10 = smov [#allocation2]  }
   0x8   :  { %v20_v9 = vld [vmem:[%s350_s0 + $0x28] sm:$0xff]  ;;  %v21_v11 = vld [vmem:[%s350_s0 + $0x30] sm:$0xff]  ;;  %v18_v12 = vld [vmem:[%s350_s0 + $0x18] sm:$0xff]  ;;  %s177_s11 = sshll.u32 %s268_s10, 4  ;;  %s178_s11 = int_to_ptr.vmem [resolvable:$true] %s177_s11 }
   0x9   :  { %236 = vmatpush3.bf16.msra.mxu0 %v233_v7  ;;  %v22_v13 = vld [vmem:[%s350_s0 + $0x38] sm:$0xff]  ;;  %v188_v14 = vld [vmem:[%s352_s2] ss:$0 sm:$0xff]  ;;  %s244_s0 = scalar_lea.vmem %s178_s11, 1024  ;;  %p249_p1 = scmp.lt.s32.totalorder %s178_s11, %s178_s11 }
   0xa   :  { %240 = vmatpush3.bf16.msra.mxu1 %v233_v7  ;;  %p245_p0 = scmp.ne.s32.totalorder %s178_s11, %s244_s0  ;;  %p250_p2 = scmp.lt.s32.totalorder %s244_s0, %s244_s0 }
   0xc   :  { %218 = vmatmul.mubr.msk.f32.vlgmr.msra.gmra.mrb[0].mxu0 %vm34_vm0, %v16_v8  ;;  %p251_p3 = por %p250_p2, %p249_p1 }
   0xd   :  { %224 = vmatmul.mubr.msk.f32.vlgmr.msra.gmra.mrb[0].mxu1 %vm34_vm0, %v20_v9  ;;  %220 = vmatprep.mubr.msk.f32.mxu0 %vm34_vm0, %v17_v10 }
   0xe   :  { %226 = vmatprep.mubr.msk.f32.mxu1 %vm34_vm0, %v21_v11  ;;  %p252_p4 = pnand %p251_p3, %p245_p0 }
  0x10   :  { %221 = vmatmul.mubr.msk.f32.gmra.mrb[2].mxu0 %vm34_vm0, %v18_v12 }
  0x11   :  { %227 = vmatmul.mubr.msk.f32.gmra.mrb[2].mxu1 %vm34_vm0, %v22_v13 }
  0xdf   :  { %v219_v15 = vpop.f32.mrb[0].mxu0 }
  0xe0   :  { %v225_v16 = vpop.f32.mrb[0].mxu1  ;;  %v131_v17 = vadd.f32 %v219_v15, %v188_v14  ;;  %v125_v19 = vpop.f32.mrb[1].mxu0 }
  0xe1   :  { %v151_v18 = vadd.f32 %v225_v16, %v188_v14  ;;  %v145_v20 = vpop.f32.mrb[1].mxu1  ;;  %v126_v21 = vadd.f32 %v188_v14, %v125_v19 }
  0xe2   :  { %v146_v22 = vadd.f32 %v188_v14, %v145_v20  ;;  %165 = vst [vmem:[#allocation2 + $0x8] sm:$0xff] %v131_v17 }
  0xe3   :  { %169 = vst [vmem:[#allocation2 + $0x28] sm:$0xff] %v151_v18  ;;  %164 = vst [vmem:[#allocation2] sm:$0xff] %v126_v21  ;;  %v222_v23 = vpop.f32.mrb[2].mxu0 }
  0xe4   :  { %168 = vst [vmem:[#allocation2 + $0x20] sm:$0xff] %v146_v22  ;;  %v228_v24 = vpop.f32.mrb[2].mxu1  ;;  %v141_v25 = vadd.f32 %v222_v23, %v188_v14  ;;  %v135_v27 = vpop.f32.mrb[3].mxu0 }
  0xe5   :  { %v161_v26 = vadd.f32 %v228_v24, %v188_v14  ;;  %v155_v28 = vpop.f32.mrb[3].mxu1  ;;  %v136_v29 = vadd.f32 %v188_v14, %v135_v27 }
  0xe6   :  { %v156_v30 = vadd.f32 %v188_v14, %v155_v28  ;;  %167 = vst [vmem:[#allocation2 + $0x18] sm:$0xff] %v141_v25 }
  0xe7   :  { %171 = vst [vmem:[#allocation2 + $0x38] sm:$0xff] %v161_v26  ;;  %166 = vst [vmem:[#allocation2 + $0x10] sm:$0xff] %v136_v29 }
  0xe8   :  { %170 = vst [vmem:[#allocation2 + $0x30] sm:$0xff] %v156_v30 }
  0xe9   :  { %255 = shalt.err (!%p252_p4)
}
  0xea   :  { %s256_s13 = scalar_lea.hbm %s353_s3, 1024 }
  0xeb   :  { %p257_p5 = scmp.ne.s32.totalorder %s353_s3, %s256_s13  ;;  %p260_p6 = scmp.lt.u32.totalorder %s256_s13, %s353_s3 }
  0xed   :  { %p262_p7 = pnand %p260_p6, %p257_p5 }
  0xef   :  { %265 = shalt.err (!%p262_p7)
}
  0xf0   :  { %s269_s18 = smov 128   ;;  %s270_s19 = smov 8  }
  0xf1   :  { %183 = dma.vmem_to_hbm [thread:$0]  %s178_s11, 1024, %s353_s3, [#allocation3], %s269_s18, %s269_s18, %s270_s19  }
  0xf2   :  { %266 = dma.done.wait [#allocation3], 1024  }
  0xf3   :  { %267 = vsyncadd [#allocation3], 4294966272 }
  0xf4   :  { %187 = vsyncpa [#allocation3], 1 }

</bundles_post_ra>
